<compile_context>
chip_gen: v5e
topology: v5e:2x2
jax: 0.10.0
libtpu: 0.0.40
codegen_flags: <defaults>
</compile_context>

<pallas_src>
from functools import partial

import jax
import jax.numpy as jnp
from jax.experimental import pallas as pl
from jax.experimental.pallas import tpu as pltpu

_MIB = 1024 * 1024
_MAX_LANES = 4096  # cap on slab width (elements); wide enough for unmasked vst


def _copy_kernel(x_ref, o_ref):
    # Identity copy of the current VMEM tile (pure data movement).
    o_ref[...] = x_ref[...]


def _vmem_capacity_bytes() -> int:
    """Best-effort physical VMEM capacity for the current chip generation."""
    try:
        return int(pltpu.get_tpu_info().vmem_capacity_bytes)
    except Exception:
        return 64 * _MIB  # conservative (v7x-sized) fallback


def _pick_lanes(n_elems: int):
    """Widest multiple-of-128 divisor of n_elems (lane-dense slab width)."""
    max_k = min(n_elems, _MAX_LANES) // 128
    for k in range(max_k, 0, -1):
        w = 128 * k
        if n_elems % w == 0:
            return w
    return None


def _pallas_copy_2d(x2d: jax.Array) -> jax.Array:
    """Stream a [rows, W] slab (W % 128 == 0) through a tiled Pallas copy."""
    n_rows, n_lanes = x2d.shape
    itemsize = x2d.dtype.itemsize
    row_bytes = n_lanes * itemsize

    # Generation-aware tile budget: ~1/8 of physical VMEM per tile (4 tiles
    # live with double buffering -> ~half of VMEM), clamped to [2, 8] MiB.
    vmem_cap = _vmem_capacity_bytes()
    tile_bytes = min(8 * _MIB, max(2 * _MIB, vmem_cap // 8))
    # Rows per tile, rounded down to a multiple of 32 so packed sub-32-bit
    # dtypes (bf16 / int8) keep fully dense sublanes without any bitcasting.
    budget_rows = max(32, (tile_bytes // row_bytes) // 32 * 32)

    if n_rows > budget_rows:
        tile_rows = budget_rows                      # grid >= 2 automatically
    elif n_rows >= 64:
        # Slab fits one tile but is big enough to split: keep grid >= 2 so
        # both v7x TensorCores participate under "parallel" sharding.
        tile_rows = ((pl.cdiv(n_rows, 2) + 31) // 32) * 32
        tile_rows = min(tile_rows, n_rows)
    else:
        tile_rows = n_rows                           # single full-array block

    grid = (pl.cdiv(n_rows, tile_rows),)
    n_bytes = n_rows * row_bytes
    vmem_limit = int(min(vmem_cap * 3 // 4, 4 * tile_rows * row_bytes + 16 * _MIB))
    vmem_limit = max(vmem_limit, 16 * _MIB)

    return pl.pallas_call(
        _copy_kernel,
        out_shape=jax.ShapeDtypeStruct((n_rows, n_lanes), x2d.dtype),
        grid_spec=pltpu.PrefetchScalarGridSpec(
            num_scalar_prefetch=0,
            grid=grid,
            in_specs=[pl.BlockSpec((tile_rows, n_lanes), lambda i: (i, 0))],
            out_specs=pl.BlockSpec((tile_rows, n_lanes), lambda i: (i, 0)),
        ),
        input_output_aliases={0: 0},
        cost_estimate=pl.CostEstimate(
            flops=0, transcendentals=0, bytes_accessed=2 * n_bytes
        ),
        compiler_params=pltpu.CompilerParams(
            dimension_semantics=("parallel",),
            vmem_limit_bytes=vmem_limit,
        ),
    )(x2d)


@partial(jax.jit, static_argnames=("out_shape",))
def _materialized_reshape(x: jax.Array, out_shape) -> jax.Array:
    """Reshape whose data is explicitly streamed through a Pallas copy."""
    total = x.size
    itemsize = x.dtype.itemsize
    eligible = (
        total > 0
        and itemsize in (1, 2, 4)
        and (jnp.issubdtype(x.dtype, jnp.floating)
             or jnp.issubdtype(x.dtype, jnp.integer))
    )
    if eligible:
        lanes = _pick_lanes(total)
        if lanes is not None:
            slab = jnp.reshape(x, (total // lanes, lanes))  # metadata only
            slab = _pallas_copy_2d(slab)                    # native dtype copy
            return jnp.reshape(slab, out_shape)
    # TODO(synk): sizes with no multiple-of-128 factorization (or 8-byte /
    # bool dtypes) skip the Pallas copy and use the metadata-only reshape.
    return jnp.reshape(x, out_shape)


class Reshape:
    """JAX/Pallas equivalent of the PyTorch Reshape module.

    By default this is the metadata-only `jnp.reshape` (the fastest possible
    path). Pass `materialize=True` to force a Pallas streaming copy when a
    physically re-laid-out buffer is explicitly required.
    """

    def __init__(self, shape, materialize: bool = False):
        if isinstance(shape, int):
            self.shape = (-1, shape)
        else:
            self.shape = (-1,) + tuple(shape)
        self.materialize = materialize

    def __call__(self, x: jax.Array) -> jax.Array:
        if self.materialize:
            return _materialized_reshape(x, self.shape)
        return jnp.reshape(x, self.shape)


if __name__ == "__main__":
    key = jax.random.PRNGKey(0)

    # Case 1: default (metadata-only) path — f32 NCHW activation -> (-1, 256).
    x = jax.random.normal(key, (2, 4, 16, 16), dtype=jnp.float32)
    y = jax.block_until_ready(Reshape(256)(x))
    ref = jnp.reshape(x, (-1, 256))
    assert y.shape == ref.shape and y.dtype == ref.dtype
    assert bool(jnp.all(y == ref))

    # Case 2: explicit materialized copy (runs the Pallas kernel), f32.
    y2 = jax.block_until_ready(Reshape(256, materialize=True)(x))
    assert y2.shape == ref.shape and y2.dtype == ref.dtype
    assert bool(jnp.all(y2 == ref))

    # Case 3: materialized copy in native bf16 (no bitcast round-trip),
    # tuple target shape.
    xb = x.astype(jnp.bfloat16)
    yb = jax.block_until_ready(Reshape((4, 64), materialize=True)(xb))
    refb = jnp.reshape(xb, (-1, 4, 64))
    assert yb.shape == refb.shape and yb.dtype == refb.dtype
    assert bool(jnp.all(yb == refb))

    # Case 4: awkward size (no 128-elem factorization) -> metadata fallback
    # even when materialization is requested.
    xc = jax.random.normal(key, (2, 3, 5), dtype=jnp.float32)
    yc = jax.block_until_ready(Reshape(5, materialize=True)(xc))
    refc = jnp.reshape(xc, (-1, 5))
    assert yc.shape == refc.shape and bool(jnp.all(yc == refc))

    print("KERNEL_OK")
</pallas_src>

<mosaic_0001>
module attributes {stable_mosaic.version = 11 : i64} {
  func.func @_copy_kernel(%arg0: i32, %arg1: memref<1x2048xf32, #tpu.memory_space<vmem>>, %arg2: memref<1x2048xf32, #tpu.memory_space<vmem>>) attributes {dimension_semantics = [#tpu.dimension_semantics<parallel>], iteration_bounds = array<i64: 1>, scalar_prefetch = 0 : i64, scratch_operands = 0 : i64, tpu.core_type = #tpu.core_type<tc>, window_params = [{transform_indices = @transform_0, window_bounds = array<i64: 1, 2048>}, {transform_indices = @transform_1, window_bounds = array<i64: 1, 2048>}]} {
    %c0 = arith.constant 0 : index
    %c0_0 = arith.constant 0 : index
    %0 = vector.load %arg1[%c0, %c0_0] : memref<1x2048xf32, #tpu.memory_space<vmem>>, vector<1x2048xf32>
    %c0_1 = arith.constant 0 : index
    %c0_2 = arith.constant 0 : index
    %1 = vector.load %arg2[%c0_1, %c0_2] : memref<1x2048xf32, #tpu.memory_space<vmem>>, vector<1x2048xf32>
    tpu.vector_store %arg2[%c0_1, %c0_2], %0 {strides = array<i32>} : memref<1x2048xf32, #tpu.memory_space<vmem>>, vector<1x2048xf32>,
    return
  }
  func.func @transform_0(%arg0: i32) -> (i32, i32) {
    %c0_i32 = arith.constant 0 : i32
    %c0_i32_0 = arith.constant 0 : i32
    return %arg0, %c0_i32 : i32, i32
  }
  func.func @transform_1(%arg0: i32) -> (i32, i32) {
    %c0_i32 = arith.constant 0 : i32
    %c0_i32_0 = arith.constant 0 : i32
    return %arg0, %c0_i32 : i32, i32
  }
}

</mosaic_0001>

<bundles_post_ra>
// kernel: _materialized_reshape.1
= control target key start
LH: loop header
LB: loop body
LE: loop exit
PB: predicated region body
PF: predicated region fallthrough
CT: control target
= control target key end

     0   :  { %s38_s0 = inlined_call_operand.vmem [shape: f32[1,2048], index: 0, kind: input, shape index: {}, may-alias: {0,1}]   ;;  %s39_s1 = inlined_call_operand.vmem [shape: f32[1,2048], index: 1, kind: output, shape index: {}, may-alias: {0,1}]  }
   0x1   :  { %v8_v0 = vld [vmem:[%s38_s0] sm:$0xff]  ;;  %v9_v1 = vld [vmem:[%s38_s0 + $0x8] sm:$0xff] }
   0x2   :  { %10 = vst [vmem:[%s39_s1] sm:$0xff] %v8_v0 }
   0x3   :  { %11 = vst [vmem:[%s39_s1 + $0x8] sm:$0xff] %v9_v1 }

</bundles_post_ra>
